<compile_context>
chip_gen: v5e
topology: v5e:2x2
jax: 0.10.0
libtpu: 0.0.40
codegen_flags: <defaults>
</compile_context>

<pallas_src>
import math

import jax
import jax.numpy as jnp
from jax import lax
from jax.experimental import pallas as pl
from jax.experimental.pallas import tpu as pltpu


def _round_up(v, m):
    return ((v + m - 1) // m) * m


def _tpu_generation_defaults():
    """Per-generation (num_core_splits, streaming VMEM budget, vmem limit)."""
    try:
        kind = jax.devices()[0].device_kind.lower()
    except Exception:  # pragma: no cover - defensive
        kind = ""
    if "v7" in kind or "7x" in kind:
        # v7x: 2 TensorCores/chip, only 64 MiB VMEM per TC.  Shard the spatial
        # range across both cores; keep the double-buffered streams well under
        # the scoped limit (headroom for scratch / compiler temporaries).
        return 2, 32 << 20, 48 << 20
    if "v6" in kind or "v5" in kind or "v4" in kind:
        # Single TensorCore, 128 MiB physical VMEM: one core split (avoids a
        # wasted clamp-duplicated block and doubled init/epilogue), big blocks.
        return 1, 40 << 20, 64 << 20
    # Unknown backend (e.g. interpret mode): conservative defaults.
    return 1, 16 << 20, 48 << 20


def _make_dice_kernel(*, S, ts, tiles_per_core, n_tiles, C, y_is_labels,
                      has_ragged, has_dup):
    """Returns the kernel body (all sizes/flags are trace-time constants)."""
    last_s = tiles_per_core - 1

    def kernel(x_ref, y_ref, out_ref, acc_i, acc_p, acc_g):
        p = pl.program_id(0)   # core-split axis (parallel)
        s = pl.program_id(1)   # spatial tile (reduction)

        @pl.when(s == 0)
        def _():
            acc_i[...] = jnp.zeros_like(acc_i)
            acc_p[...] = jnp.zeros_like(acc_p)
            acc_g[...] = jnp.zeros_like(acc_g)

        logical_tile = p * tiles_per_core + s

        def accumulate(mask_row):
            # Elementwise mask / one-hot select in the *native* dtype (bf16
            # keeps 2x vreg packing); upcast to f32 only at the sums.
            xs = x_ref[...]                                    # (B, C, ts)
            if mask_row is not None:
                xs = jnp.where(mask_row[:, None, :], xs, jnp.zeros_like(xs))
            x_f = xs.astype(jnp.float32)

            if y_is_labels:
                labels = y_ref[...].astype(jnp.int32)          # (B, ts)
                if mask_row is not None:
                    # Send masked columns to the non-existent class C.
                    labels = jnp.where(mask_row, labels, jnp.int32(C))
                chan = lax.broadcasted_iota(jnp.int32, (1, C, 1), 1)
                onehot = labels[:, None, :] == chan            # (B, C, ts)
                y_f = onehot.astype(jnp.float32)
                inter_f = jnp.where(onehot, xs, jnp.zeros_like(xs)
                                    ).astype(jnp.float32)
            else:
                ys = y_ref[...]                                # (B, C, ts)
                if mask_row is not None:
                    ys = jnp.where(mask_row[:, None, :], ys, jnp.zeros_like(ys))
                y_f = ys.astype(jnp.float32)
                inter_f = x_f * y_f

            acc_i[...] += jnp.sum(inter_f, axis=-1, keepdims=True)
            acc_p[...] += jnp.sum(x_f, axis=-1, keepdims=True)
            acc_g[...] += jnp.sum(y_f, axis=-1, keepdims=True)

        # CORRECTNESS INVARIANT: the last real tile reads columns past S and
        # clamp-duplicated tiles re-read tile n_tiles-1 (index_map clamps the
        # DMA so it never goes OOB in HBM).  Those contributions MUST be
        # zeroed by the masked path / skipped entirely below.
        if has_ragged:
            # Steady-state tiles: unmasked fast path (no iota / selects).
            is_tail = logical_tile >= (n_tiles - 1)

            @pl.when(jnp.logical_not(is_tail))
            def _():
                accumulate(None)

            @pl.when(is_tail)
            def _():
                col = lax.broadcasted_iota(jnp.int32, (1, ts), 1)   # (1, ts)
                mask_row = col < (S - logical_tile * ts)
                accumulate(mask_row)
        elif has_dup:
            # No ragged tail, but an odd tile count with 2 core splits leaves
            # one clamp-duplicated tile: skip its accumulation entirely.
            @pl.when(logical_tile < n_tiles)
            def _():
                accumulate(None)
        else:
            accumulate(None)

        @pl.when(s == last_s)
        def _():
            out_ref[0, 0, :, :] = acc_i[...][:, :, 0]
            out_ref[0, 1, :, :] = acc_p[...][:, :, 0]
            out_ref[0, 2, :, :] = acc_g[...][:, :, 0]

    return kernel


def _dice_reductions(x3, y_arr, *, y_is_labels, num_core_splits=None,
                     spatial_tile=None, stream_vmem_budget=None,
                     vmem_limit_bytes=None):
    """Per-(b, c) spatial sums.

    x3:    (B, C, S) predictions, streamed in their native dtype.
    y_arr: (B, S) integer label map (y_is_labels=True) or (B, C, S) dense
           target (soft / one-hot / bool), also streamed in native dtype.
    Returns (intersect, sum_pred, sum_gt), each (B, C) float32.
    """
    B, C, S = x3.shape

    d_splits, d_budget, d_limit = _tpu_generation_defaults()
    if num_core_splits is None:
        num_core_splits = d_splits
    if stream_vmem_budget is None:
        stream_vmem_budget = d_budget
    if vmem_limit_bytes is None:
        vmem_limit_bytes = d_limit

    # ---- spatial tile size --------------------------------------------------
    # VMEM bytes per spatial column, counting the C -> 8 sublane padding Mosaic
    # applies, the second (y) stream, and 2x for double-buffered pipelining.
    x_col_bytes = B * _round_up(C, 8) * x3.dtype.itemsize
    if y_is_labels:
        y_col_bytes = _round_up(B, 8) * y_arr.dtype.itemsize
    else:
        y_col_bytes = B * _round_up(C, 8) * y_arr.dtype.itemsize
    bytes_per_col = 2 * (x_col_bytes + y_col_bytes)

    if spatial_tile is not None:
        ts = min(int(spatial_tile), S)
    else:
        ts = (stream_vmem_budget // bytes_per_col) // 128 * 128
        ts = max(ts, 128)
    if ts >= S:
        ts = S                      # single full-extent tile (any S allowed)
    else:
        assert ts % 128 == 0, "interior spatial tiles must be lane-aligned"

    n_tiles = pl.cdiv(S, ts)
    num_core_splits = max(1, min(int(num_core_splits), n_tiles))
    tiles_per_core = pl.cdiv(n_tiles, num_core_splits)

    has_ragged = (S % ts) != 0                                  # last tile partial
    has_dup = num_core_splits * tiles_per_core > n_tiles        # clamp duplicate

    def x_map(p, s):
        return (0, 0, jnp.minimum(p * tiles_per_core + s, n_tiles - 1))

    if y_is_labels:
        def y_map(p, s):
            return (0, jnp.minimum(p * tiles_per_core + s, n_tiles - 1))
        y_spec = pl.BlockSpec((B, ts), y_map)
    else:
        y_spec = pl.BlockSpec((B, C, ts), x_map)

    kernel = _make_dice_kernel(
        S=S, ts=ts, tiles_per_core=tiles_per_core, n_tiles=n_tiles, C=C,
        y_is_labels=y_is_labels, has_ragged=has_ragged, has_dup=has_dup)

    out = pl.pallas_call(
        kernel,
        out_shape=jax.ShapeDtypeStruct((num_core_splits, 3, B, C), jnp.float32),
        grid_spec=pltpu.PrefetchScalarGridSpec(
            num_scalar_prefetch=0,
            grid=(num_core_splits, tiles_per_core),
            in_specs=[pl.BlockSpec((B, C, ts), x_map), y_spec],
            out_specs=pl.BlockSpec((1, 3, B, C), lambda p, s: (p, 0, 0, 0)),
            scratch_shapes=[pltpu.VMEM((B, C, 1), jnp.float32)] * 3,
        ),
        compiler_params=pltpu.CompilerParams(
            dimension_semantics=("parallel", "arbitrary"),
            vmem_limit_bytes=vmem_limit_bytes),
    )(x3, y_arr)

    sums = out.sum(axis=0)          # add the per-core partials (3 adds on B*C)
    return sums[0], sums[1], sums[2]


def memory_efficient_soft_dice_loss(x, y, loss_mask=None, *, apply_nonlin=None,
                                    batch_dice=False, do_bg=True, smooth=1.0):
    """Forward pass of MemoryEfficientSoftDiceLoss (loss_mask unsupported)."""
    # TODO(synk): loss_mask weighting path not implemented (module default None).
    assert loss_mask is None, "loss_mask not supported in this kernel"

    if apply_nonlin is not None:
        x = apply_nonlin(x)

    B, C = x.shape[0], x.shape[1]
    S = math.prod(x.shape[2:])
    x3 = x.reshape(B, C, S)

    if y.ndim != x.ndim:
        y = y.reshape((y.shape[0], 1) + y.shape[1:])

    if x.shape == y.shape:
        # y already provides per-channel (soft / one-hot / bool) targets;
        # stream it in its native dtype and cast to f32 inside the kernel.
        y_arr = y.reshape(B, C, S)
        y_is_labels = False
    else:
        # Integer label map: one-hot is computed inside the kernel.  Stream in
        # the native (possibly narrow) integer dtype; cast to int32 on-chip.
        y_arr = y.reshape(B, S)
        if not jnp.issubdtype(y_arr.dtype, jnp.integer):
            y_arr = y_arr.astype(jnp.int32)   # e.g. float-typed label maps
        y_is_labels = True

    intersect, sum_pred, sum_gt = _dice_reductions(x3, y_arr,
                                                   y_is_labels=y_is_labels)

    if not do_bg:
        # Equivalent to slicing x / y_onehot before the reduction, but done on
        # the tiny (B, C) results to avoid an HBM copy of x[:, 1:].
        intersect = intersect[:, 1:]
        sum_pred = sum_pred[:, 1:]
        sum_gt = sum_gt[:, 1:]

    if batch_dice:
        intersect = intersect.sum(0)
        sum_pred = sum_pred.sum(0)
        sum_gt = sum_gt.sum(0)

    dc = (2.0 * intersect + smooth) / jnp.clip(sum_gt + sum_pred + smooth, 1e-8)
    return -dc.mean()


# ----------------------------------------------------------------------------
# Pure-JAX reference for sanity checking
# ----------------------------------------------------------------------------
def _reference(x, y, *, batch_dice=False, do_bg=True, smooth=1.0):
    B, C = x.shape[0], x.shape[1]
    labels = y.astype(jnp.int32)
    y_onehot = jnp.moveaxis(jax.nn.one_hot(labels, C, dtype=x.dtype), -1, 1)
    if not do_bg:
        y_onehot = y_onehot[:, 1:]
        x = x[:, 1:]
    axes = tuple(range(2, x.ndim))
    intersect = (x * y_onehot).sum(axes)
    sum_pred = x.sum(axes)
    sum_gt = y_onehot.sum(axes)
    if batch_dice:
        intersect, sum_pred, sum_gt = (a.sum(0) for a in (intersect, sum_pred, sum_gt))
    dc = (2 * intersect + smooth) / jnp.clip(sum_gt + sum_pred + smooth, 1e-8)
    return -dc.mean()


if __name__ == "__main__":
    key = jax.random.PRNGKey(0)
    k1, k2, k3, k4, k5, k6 = jax.random.split(key, 6)

    B, C, H, W = 2, 4, 16, 16
    x = jax.random.normal(k1, (B, C, H, W), dtype=jnp.float32)     # probs/logits
    y = jax.random.randint(k2, (B, H, W), 0, C)                    # int32 labels

    loss = jax.block_until_ready(memory_efficient_soft_dice_loss(x, y))
    ref = _reference(x, y)
    assert jnp.allclose(loss, ref, atol=1e-4, rtol=1e-4), (loss, ref)

    # Narrow-dtype label map streamed directly (cast to int32 inside kernel).
    loss_u8 = jax.block_until_ready(
        memory_efficient_soft_dice_loss(x, y.astype(jnp.uint8)))
    assert jnp.allclose(loss_u8, ref, atol=1e-4, rtol=1e-4), (loss_u8, ref)

    # do_bg=False + batch_dice=True path (result slicing / batch sum).
    loss2 = jax.block_until_ready(
        memory_efficient_soft_dice_loss(x, y, batch_dice=True, do_bg=False))
    ref2 = _reference(x, y, batch_dice=True, do_bg=False)
    assert jnp.allclose(loss2, ref2, atol=1e-4, rtol=1e-4), (loss2, ref2)

    # Ragged spatial extent (S = 160, single full-extent tile).
    xr = jax.random.normal(k3, (B, C, 16, 10), dtype=jnp.float32)
    yr = jax.random.randint(k4, (B, 16, 10), 0, C)
    loss3 = jax.block_until_ready(memory_efficient_soft_dice_loss(xr, yr))
    ref3 = _reference(xr, yr)
    assert jnp.allclose(loss3, ref3, atol=1e-4, rtol=1e-4), (loss3, ref3)

    # Dense (soft / one-hot) target path: x.shape == y.shape.
    y_dense = jnp.moveaxis(jax.nn.one_hot(y, C, dtype=jnp.float32), -1, 1)
    loss4 = jax.block_until_ready(memory_efficient_soft_dice_loss(x, y_dense))
    assert jnp.allclose(loss4, ref, atol=1e-4, rtol=1e-4), (loss4, ref)

    # Multi-tile accumulation + core-split axis (forced small tiles).
    x3 = x.reshape(B, C, H * W)
    lab = y.reshape(B, H * W)
    oh = jnp.moveaxis(jax.nn.one_hot(y, C, dtype=x.dtype), -1, 1).reshape(B, C, -1)
    it, sp, sg = _dice_reductions(x3, lab, y_is_labels=True,
                                  num_core_splits=2, spatial_tile=128)
    assert jnp.allclose(it, (x3 * oh).sum(-1), atol=1e-3, rtol=1e-4)
    assert jnp.allclose(sp, x3.sum(-1), atol=1e-3, rtol=1e-4)
    assert jnp.allclose(sg, oh.sum(-1), atol=1e-3, rtol=1e-4)

    # Odd tile count with 2 core splits (clamp-duplicate skip path, no ragged).
    x5 = jax.random.normal(k5, (B, C, 384), dtype=jnp.float32)
    y5 = jax.random.randint(k6, (B, 384), 0, C)
    oh5 = jnp.moveaxis(jax.nn.one_hot(y5, C, dtype=x5.dtype), -1, 1)
    it5, sp5, sg5 = _dice_reductions(x5, y5, y_is_labels=True,
                                     num_core_splits=2, spatial_tile=128)
    assert jnp.allclose(it5, (x5 * oh5).sum(-1), atol=1e-3, rtol=1e-4)
    assert jnp.allclose(sp5, x5.sum(-1), atol=1e-3, rtol=1e-4)
    assert jnp.allclose(sg5, oh5.sum(-1), atol=1e-3, rtol=1e-4)

    # Ragged + multi-tile + core splits (predicated tail-mask path).
    x6, y6, oh6 = x5[:, :, :330], y5[:, :330], oh5[:, :, :330]
    it6, sp6, sg6 = _dice_reductions(x6, y6, y_is_labels=True,
                                     num_core_splits=2, spatial_tile=128)
    assert jnp.allclose(it6, (x6 * oh6).sum(-1), atol=1e-3, rtol=1e-4)
    assert jnp.allclose(sp6, x6.sum(-1), atol=1e-3, rtol=1e-4)
    assert jnp.allclose(sg6, oh6.sum(-1), atol=1e-3, rtol=1e-4)

    print("KERNEL_OK")
</pallas_src>

<mosaic_0001>
module attributes {stable_mosaic.version = 11 : i64} {
  func.func @kernel(%arg0: i32, %arg1: i32, %arg2: memref<2x4x256xf32, #tpu.memory_space<vmem>>, %arg3: memref<2x256xi32, #tpu.memory_space<vmem>>, %arg4: memref<1x3x2x4xf32, #tpu.memory_space<vmem>>, %arg5: memref<2x4x1xf32, #tpu.memory_space<vmem>>, %arg6: memref<2x4x1xf32, #tpu.memory_space<vmem>>, %arg7: memref<2x4x1xf32, #tpu.memory_space<vmem>>) attributes {dimension_semantics = [#tpu.dimension_semantics<parallel>, #tpu.dimension_semantics<arbitrary>], iteration_bounds = array<i64: 1, 1>, scalar_prefetch = 0 : i64, scratch_operands = 3 : i64, tpu.core_type = #tpu.core_type<tc>, window_params = [{transform_indices = @transform_0, window_bounds = array<i64: 2, 4, 256>}, {transform_indices = @transform_1, window_bounds = array<i64: 2, 256>}, {transform_indices = @transform_2, window_bounds = array<i64: 1, 3, 2, 4>}]} {
    %c0_i32 = arith.constant 0 : i32
    %0 = arith.cmpi eq, %arg1, %c0_i32 : i32
    %1 = arith.extui %0 : i1 to i32
    %c0_i32_0 = arith.constant 0 : i32
    %2 = arith.cmpi ne, %1, %c0_i32_0 : i32
    scf.if %2 {
      %cst_28 = arith.constant 0.000000e+00 : f32
      %32 = vector.broadcast %cst_28 : f32 to vector<2x4x1xf32>
      %c0_29 = arith.constant 0 : index
      %c0_30 = arith.constant 0 : index
      %c0_31 = arith.constant 0 : index
      %33 = vector.load %arg5[%c0_29, %c0_30, %c0_31] : memref<2x4x1xf32, #tpu.memory_space<vmem>>, vector<2x4x1xf32>
      tpu.vector_store %arg5[%c0_29, %c0_30, %c0_31], %32 {strides = array<i32>} : memref<2x4x1xf32, #tpu.memory_space<vmem>>, vector<2x4x1xf32>,
      %cst_32 = arith.constant 0.000000e+00 : f32
      %34 = vector.broadcast %cst_32 : f32 to vector<2x4x1xf32>
      %c0_33 = arith.constant 0 : index
      %c0_34 = arith.constant 0 : index
      %c0_35 = arith.constant 0 : index
      %35 = vector.load %arg6[%c0_33, %c0_34, %c0_35] : memref<2x4x1xf32, #tpu.memory_space<vmem>>, vector<2x4x1xf32>
      tpu.vector_store %arg6[%c0_33, %c0_34, %c0_35], %34 {strides = array<i32>} : memref<2x4x1xf32, #tpu.memory_space<vmem>>, vector<2x4x1xf32>,
      %cst_36 = arith.constant 0.000000e+00 : f32
      %36 = vector.broadcast %cst_36 : f32 to vector<2x4x1xf32>
      %c0_37 = arith.constant 0 : index
      %c0_38 = arith.constant 0 : index
      %c0_39 = arith.constant 0 : index
      %37 = vector.load %arg7[%c0_37, %c0_38, %c0_39] : memref<2x4x1xf32, #tpu.memory_space<vmem>>, vector<2x4x1xf32>
      tpu.vector_store %arg7[%c0_37, %c0_38, %c0_39], %36 {strides = array<i32>} : memref<2x4x1xf32, #tpu.memory_space<vmem>>, vector<2x4x1xf32>,
    } else {
    }
    %c0 = arith.constant 0 : index
    %c0_1 = arith.constant 0 : index
    %c0_2 = arith.constant 0 : index
    %3 = vector.load %arg2[%c0, %c0_1, %c0_2] : memref<2x4x256xf32, #tpu.memory_space<vmem>>, vector<2x4x256xf32>
    %c0_3 = arith.constant 0 : index
    %c0_4 = arith.constant 0 : index
    %4 = vector.load %arg3[%c0_3, %c0_4] : memref<2x256xi32, #tpu.memory_space<vmem>>, vector<2x256xi32>
    %5 = tpu.iota {dimensions = array<i32: 1>} : vector<1x4x1xi32>
    %6 = vector.shape_cast %4 : vector<2x256xi32> to vector<2x1x256xi32>
    %7 = vector.broadcast %6 : vector<2x1x256xi32> to vector<2x4x256xi32>
    %8 = vector.broadcast %5 : vector<1x4x1xi32> to vector<2x4x256xi32>
    %9 = arith.cmpi eq, %7, %8 : vector<2x4x256xi32>
    %10 = arith.extui %9 : vector<2x4x256xi1> to vector<2x4x256xi32>
    %11 = arith.sitofp %10 : vector<2x4x256xi32> to vector<2x4x256xf32>
    %cst = arith.constant 0.000000e+00 : f32
    %12 = vector.broadcast %cst : f32 to vector<2x4x256xf32>
    %13 = arith.select %9, %3, %12 : vector<2x4x256xi1>, vector<2x4x256xf32>
    %c0_5 = arith.constant 0 : index
    %c0_6 = arith.constant 0 : index
    %c0_7 = arith.constant 0 : index
    %14 = vector.load %arg5[%c0_5, %c0_6, %c0_7] : memref<2x4x1xf32, #tpu.memory_space<vmem>>, vector<2x4x1xf32>
    %cst_8 = arith.constant dense<0.000000e+00> : vector<2x4xf32>
    %15 = vector.multi_reduction <add>, %13, %cst_8 [2] : vector<2x4x256xf32> to vector<2x4xf32>
    %16 = vector.shape_cast %15 : vector<2x4xf32> to vector<2x4x1xf32>
    %17 = arith.addf %14, %16 : vector<2x4x1xf32>
    %c0_9 = arith.constant 0 : index
    %c0_10 = arith.constant 0 : index
    %c0_11 = arith.constant 0 : index
    %18 = vector.load %arg5[%c0_9, %c0_10, %c0_11] : memref<2x4x1xf32, #tpu.memory_space<vmem>>, vector<2x4x1xf32>
    tpu.vector_store %arg5[%c0_9, %c0_10, %c0_11], %17 {strides = array<i32>} : memref<2x4x1xf32, #tpu.memory_space<vmem>>, vector<2x4x1xf32>,
    %c0_12 = arith.constant 0 : index
    %c0_13 = arith.constant 0 : index
    %c0_14 = arith.constant 0 : index
    %19 = vector.load %arg6[%c0_12, %c0_13, %c0_14] : memref<2x4x1xf32, #tpu.memory_space<vmem>>, vector<2x4x1xf32>
    %cst_15 = arith.constant dense<0.000000e+00> : vector<2x4xf32>
    %20 = vector.multi_reduction <add>, %3, %cst_15 [2] : vector<2x4x256xf32> to vector<2x4xf32>
    %21 = vector.shape_cast %20 : vector<2x4xf32> to vector<2x4x1xf32>
    %22 = arith.addf %19, %21 : vector<2x4x1xf32>
    %c0_16 = arith.constant 0 : index
    %c0_17 = arith.constant 0 : index
    %c0_18 = arith.constant 0 : index
    %23 = vector.load %arg6[%c0_16, %c0_17, %c0_18] : memref<2x4x1xf32, #tpu.memory_space<vmem>>, vector<2x4x1xf32>
    tpu.vector_store %arg6[%c0_16, %c0_17, %c0_18], %22 {strides = array<i32>} : memref<2x4x1xf32, #tpu.memory_space<vmem>>, vector<2x4x1xf32>,
    %c0_19 = arith.constant 0 : index
    %c0_20 = arith.constant 0 : index
    %c0_21 = arith.constant 0 : index
    %24 = vector.load %arg7[%c0_19, %c0_20, %c0_21] : memref<2x4x1xf32, #tpu.memory_space<vmem>>, vector<2x4x1xf32>
    %cst_22 = arith.constant dense<0.000000e+00> : vector<2x4xf32>
    %25 = vector.multi_reduction <add>, %11, %cst_22 [2] : vector<2x4x256xf32> to vector<2x4xf32>
    %26 = vector.shape_cast %25 : vector<2x4xf32> to vector<2x4x1xf32>
    %27 = arith.addf %24, %26 : vector<2x4x1xf32>
    %c0_23 = arith.constant 0 : index
    %c0_24 = arith.constant 0 : index
    %c0_25 = arith.constant 0 : index
    %28 = vector.load %arg7[%c0_23, %c0_24, %c0_25] : memref<2x4x1xf32, #tpu.memory_space<vmem>>, vector<2x4x1xf32>
    tpu.vector_store %arg7[%c0_23, %c0_24, %c0_25], %27 {strides = array<i32>} : memref<2x4x1xf32, #tpu.memory_space<vmem>>, vector<2x4x1xf32>,
    %c0_i32_26 = arith.constant 0 : i32
    %29 = arith.cmpi eq, %arg1, %c0_i32_26 : i32
    %30 = arith.extui %29 : i1 to i32
    %c0_i32_27 = arith.constant 0 : i32
    %31 = arith.cmpi ne, %30, %c0_i32_27 : i32
    scf.if %31 {
      %c0_28 = arith.constant 0 : index
      %c0_29 = arith.constant 0 : index
      %c0_30 = arith.constant 0 : index
      %32 = vector.load %arg5[%c0_28, %c0_29, %c0_30] : memref<2x4x1xf32, #tpu.memory_space<vmem>>, vector<2x4x1xf32>
      %33 = vector.shape_cast %32 : vector<2x4x1xf32> to vector<2x4xf32>
      %c0_31 = arith.constant 0 : index
      %c0_32 = arith.constant 0 : index
      %c0_33 = arith.constant 0 : index
      %c0_34 = arith.constant 0 : index
      %34 = vector.load %arg4[%c0_31, %c0_32, %c0_33, %c0_34] : memref<1x3x2x4xf32, #tpu.memory_space<vmem>>, vector<1x1x2x4xf32>
      %35 = vector.shape_cast %34 : vector<1x1x2x4xf32> to vector<2x4xf32>
      %36 = vector.shape_cast %33 : vector<2x4xf32> to vector<1x1x2x4xf32>
      tpu.vector_store %arg4[%c0_31, %c0_32, %c0_33, %c0_34], %36 {strides = array<i32>} : memref<1x3x2x4xf32, #tpu.memory_space<vmem>>, vector<1x1x2x4xf32>,
      %c0_35 = arith.constant 0 : index
      %c0_36 = arith.constant 0 : index
      %c0_37 = arith.constant 0 : index
      %37 = vector.load %arg6[%c0_35, %c0_36, %c0_37] : memref<2x4x1xf32, #tpu.memory_space<vmem>>, vector<2x4x1xf32>
      %38 = vector.shape_cast %37 : vector<2x4x1xf32> to vector<2x4xf32>
      %c0_38 = arith.constant 0 : index
      %c1 = arith.constant 1 : index
      %c0_39 = arith.constant 0 : index
      %c0_40 = arith.constant 0 : index
      %39 = vector.load %arg4[%c0_38, %c1, %c0_39, %c0_40] : memref<1x3x2x4xf32, #tpu.memory_space<vmem>>, vector<1x1x2x4xf32>
      %40 = vector.shape_cast %39 : vector<1x1x2x4xf32> to vector<2x4xf32>
      %41 = vector.shape_cast %38 : vector<2x4xf32> to vector<1x1x2x4xf32>
      tpu.vector_store %arg4[%c0_38, %c1, %c0_39, %c0_40], %41 {strides = array<i32>} : memref<1x3x2x4xf32, #tpu.memory_space<vmem>>, vector<1x1x2x4xf32>,
      %c0_41 = arith.constant 0 : index
      %c0_42 = arith.constant 0 : index
      %c0_43 = arith.constant 0 : index
      %42 = vector.load %arg7[%c0_41, %c0_42, %c0_43] : memref<2x4x1xf32, #tpu.memory_space<vmem>>, vector<2x4x1xf32>
      %43 = vector.shape_cast %42 : vector<2x4x1xf32> to vector<2x4xf32>
      %c0_44 = arith.constant 0 : index
      %c2 = arith.constant 2 : index
      %c0_45 = arith.constant 0 : index
      %c0_46 = arith.constant 0 : index
      %44 = vector.load %arg4[%c0_44, %c2, %c0_45, %c0_46] : memref<1x3x2x4xf32, #tpu.memory_space<vmem>>, vector<1x1x2x4xf32>
      %45 = vector.shape_cast %44 : vector<1x1x2x4xf32> to vector<2x4xf32>
      %46 = vector.shape_cast %43 : vector<2x4xf32> to vector<1x1x2x4xf32>
      tpu.vector_store %arg4[%c0_44, %c2, %c0_45, %c0_46], %46 {strides = array<i32>} : memref<1x3x2x4xf32, #tpu.memory_space<vmem>>, vector<1x1x2x4xf32>,
    } else {
    }
    return
  }
  func.func @transform_0(%arg0: i32, %arg1: i32) -> (i32, i32, i32) {
    %c1_i32 = arith.constant 1 : i32
    %0 = arith.muli %arg0, %c1_i32 : i32
    %1 = arith.addi %0, %arg1 : i32
    %c0_i32 = arith.constant 0 : i32
    %2 = arith.minsi %1, %c0_i32 : i32
    %c0_i32_0 = arith.constant 0 : i32
    %c0_i32_1 = arith.constant 0 : i32
    %c0_i32_2 = arith.constant 0 : i32
    return %c0_i32_0, %c0_i32_1, %2 : i32, i32, i32
  }
  func.func @transform_1(%arg0: i32, %arg1: i32) -> (i32, i32) {
    %c1_i32 = arith.constant 1 : i32
    %0 = arith.muli %arg0, %c1_i32 : i32
    %1 = arith.addi %0, %arg1 : i32
    %c0_i32 = arith.constant 0 : i32
    %2 = arith.minsi %1, %c0_i32 : i32
    %c0_i32_0 = arith.constant 0 : i32
    %c0_i32_1 = arith.constant 0 : i32
    return %c0_i32_0, %2 : i32, i32
  }
  func.func @transform_2(%arg0: i32, %arg1: i32) -> (i32, i32, i32, i32) {
    %c0_i32 = arith.constant 0 : i32
    %c0_i32_0 = arith.constant 0 : i32
    %c0_i32_1 = arith.constant 0 : i32
    %c0_i32_2 = arith.constant 0 : i32
    return %arg0, %c0_i32, %c0_i32_0, %c0_i32_1 : i32, i32, i32, i32
  }
}

</mosaic_0001>

<bundles_post_ra>
// kernel: tpu_custom_call.1
= control target key start
LH: loop header
LB: loop body
LE: loop exit
PB: predicated region body
PF: predicated region fallthrough
CT: control target
= control target key end

     0   :  { %7 = vsyncpa [#allocation6], 0  ;;  %s439_s0 = inlined_call_operand.hbm [shape: f32[2,4,256], index: 0, kind: input, shape index: {}]   ;;  %s440_s1 = inlined_call_operand.hbm [shape: s32[2,256], index: 1, kind: input, shape index: {}]   ;;  %s441_s2 = inlined_call_operand.hbm [shape: f32[1,3,2,4], index: 2, kind: output, shape index: {}]  }
   0x1   :  { %8 = vsyncpa [#allocation9], 0 }
   0x2   :  { %9 = vsyncpa [#allocation7], 0  ;;  %s20_s11 = sshll.u32 %s439_s0, 4  ;;  %s359_s12 = smov [#allocation5]   ;;  %s21_s11 = int_to_ptr.hbm [resolvable:$true] %s20_s11 }
   0x3   :  { %s22_s13 = sshll.u32 %s359_s12, 4  ;;  %s40_s16 = sshll.u32 %s440_s1, 4  ;;  %s23_s13 = int_to_ptr.vmem [resolvable:$true] %s22_s13  ;;  %s41_s16 = int_to_ptr.hbm [resolvable:$true] %s40_s16 }
   0x4   :  { %s360_s17 = smov 128   ;;  %s361_s18 = smov 8  }
   0x5   :  { %28 = dma.hbm_to_vmem [thread:$0]  %s21_s11, 256, %s23_s13, [#allocation6], %s360_s17, %s360_s17, %s361_s18  }
   0x6   :  { %s362_s19 = smov [#allocation8]  }
   0x7   :  { %s42_s20 = sshll.u32 %s362_s19, 4  ;;  %s43_s20 = int_to_ptr.vmem [resolvable:$true] %s42_s20 }
   0x8   :  { %45 = dma.hbm_to_vmem [thread:$0]  %s41_s16, 64, %s43_s20, [#allocation9]  }
   0x9   :  { %353 = dma.done.wait [#allocation6], 256  }
   0xa   :  { %354 = vsyncadd [#allocation6], 4294967040 }
   0xb   :  { %355 = dma.done.wait [#allocation9], 64  }
   0xc   :  { %356 = vsyncadd [#allocation9], 4294967232  ;;  %vm66_vm0 = vcmask 3072   ;;  %v363_v0 = vmov 0.0   ;;  %v76_v1 = vlaneseq  ;;  %vm81_vm1 = vcmask 1040384   ;;  %v73_v2 = vld [vmem:[#allocation5] sm:$0xff] }
   0xd   :  { %67 = vst.msk [vmem:[#allocation2] sm:$0xf] %vm66_vm0, %v363_v0  ;;  %vm83_vm2 = vcmask 1042434   ;;  %vm85_vm3 = vcmask 1041408   ;;  %vm87_vm4 = vcmask 1041409   ;;  %vm89_vm5 = vcmask 1043459  }
   0xe   :  { %68 = vst.msk [vmem:[#allocation2 + $0x4] sm:$0xf] %vm66_vm0, %v363_v0  ;;  %v75_v3 = vld [vmem:[#allocation8] sm:$0xf]  ;;  %v74_v4 = vld [vmem:[#allocation5 + $0x8] sm:$0xff]  ;;  %vm91_vm6 = vcmask 1042433  }
   0xf   :  { %69 = vst.msk [vmem:[#allocation3] sm:$0xf] %vm66_vm0, %v363_v0  ;;  %v78_v5 = vrot.slane %v75_v3, 1  ;;  %v79_v6 = vrot.slane %v75_v3, 2  ;;  %v80_v7 = vrot.slane %v75_v3, 3  ;;  %v77_v8 = vshrl.u32 %v76_v1, 7 }
  0x10   :  { %70 = vst.msk [vmem:[#allocation3 + $0x4] sm:$0xf] %vm66_vm0, %v363_v0  ;;  %vm129_vm7 = vcmask 1043456   ;;  %v364_v55 = vmov 0   ;;  %v202_v18 = vand.u32 127, %v76_v1  ;;  %vm207_vm12 = vcmask 25600  }
  0x11   :  { %112 = vst [vmem:[#allocation1] ss:$2 sm:$0xff] %v73_v2  ;;  %v82_v9 = vsel %vm81_vm1, %v75_v3, %v78_v5  ;;  %v84_v10 = vsel %vm83_vm2, %v79_v6, %v80_v7  ;;  %v88_v11 = vsel %vm87_vm4, %v75_v3, %v78_v5  ;;  %v90_v12 = vsel %vm89_vm5, %v79_v6, %v80_v7  ;;  %s365_s0 = smov [#allocation10]   ;;  %s247_s23 = sshll.u32 %s441_s2, 4  ;;  %s248_s23 = int_to_ptr.hbm [resolvable:$true] %s247_s23 }
  0x12   :  { %116 = vst [vmem:[#allocation1 + $0x10] ss:$2 sm:$0xff] %v74_v4  ;;  %v86_v13 = vsel %vm85_vm3, %v82_v9, %v84_v10  ;;  %v92_v14 = vsel %vm91_vm6, %v88_v11, %v90_v12  ;;  %278 = vset.pattern.permute.xlu0 %v364_v55  ;;  %280 = vset.pattern.permute.xlu2 %v364_v55  ;;  %s245_s1 = sshll.u32 %s365_s0, 4  ;;  %s366_s24 = smov 32   ;;  %s246_s1 = int_to_ptr.vmem [resolvable:$true] %s245_s1 }
  0x13   :  { %71 = vst.msk [vmem:[#allocation4] sm:$0xf] %vm66_vm0, %v363_v0  ;;  %v94_v15 = vperm.slane %v86_v13, 0  ;;  %v95_v16 = vperm.slane %v86_v13, 1  ;;  %v93_v17 = vrot.slane %v92_v14, 1  ;;  %279 = vset.pattern.permute.xlu1 %v364_v55  ;;  %s367_s25 = smov 2  }
  0x14   :  { %72 = vst.msk [vmem:[#allocation4 + $0x4] sm:$0xf] %vm66_vm0, %v363_v0  ;;  %v127_v56 = vld [vmem:[#allocation2] sm:$0xf] }
  0x15   :  { %vm98_vm8 = vcmp.eq.s32.totalorder %v94_v15, %v77_v8  ;;  %vm401_vm9 = vcmp.eq.s32.totalorder %v95_v16, %v77_v8  ;;  %v96_v19 = vperm.slane %v93_v17, 0  ;;  %v97_v20 = vperm.slane %v93_v17, 1  ;;  %v128_v63 = vld [vmem:[#allocation2 + $0x4] sm:$0xf] }
  0x16   :  { %v265_v28 = vsel %vm98_vm8, 1.0, %v363_v0  ;;  %v266_v32 = vsel %vm401_vm9, 1.0, %v363_v0  ;;  %v145_v62 = vld [vmem:[#allocation3] sm:$0xf] }
  0x17   :  { %vm100_vm10 = vcmp.eq.s32.totalorder %v96_v19, %v77_v8  ;;  %vm101_vm11 = vcmp.eq.s32.totalorder %v97_v20, %v77_v8  ;;  %v174_v33 = vsel %vm129_vm7, %v265_v28, 0.0  ;;  %v175_v35 = vsel %vm129_vm7, %v266_v32, 0.0  ;;  %v146_v9 = vld [vmem:[#allocation3 + $0x4] sm:$0xf] }
  0x18   :  { %v113_v21 = vld.sshfl [vmem:[#allocation1] sm:$0xff pattern:$0x75316420]  ;;  %v114_v22 = vld.sshfl [vmem:[#allocation1 + $0x8] sm:$0xff pattern:$0x75316420]  ;;  %v176_v37 = vadd.f32 %v175_v35, %v174_v33 }
  0x19   :  { %v123_v23 = vsel %vm98_vm8, %v113_v21, 0.0  ;;  %v124_v24 = vsel %vm401_vm9, %v114_v22, 0.0  ;;  %147 = vst [vmem:[#allocation1] ss:$2 sm:$0xff] %v73_v2  ;;  %v267_v36 = vsel %vm100_vm10, 1.0, %v363_v0  ;;  %v268_v38 = vsel %vm101_vm11, 1.0, %v363_v0 }
  0x1a   :  { %v130_v25 = vsel %vm129_vm7, %v123_v23, 0.0  ;;  %v131_v26 = vsel %vm129_vm7, %v124_v24, 0.0  ;;  %v117_v27 = vld.sshfl [vmem:[#allocation1 + $0x10] sm:$0xff pattern:$0x75316420]  ;;  %177 = vadd.xlane.f32.xlu2 %v176_v37  ;;  %v179_v41 = vsel %vm129_vm7, %v267_v36, 0.0 }
  0x1b   :  { %v132_v29 = vadd.f32 %v131_v26, %v130_v25  ;;  %v118_v30 = vld.sshfl [vmem:[#allocation1 + $0x18] sm:$0xff pattern:$0x75316420]  ;;  %v125_v31 = vsel %vm100_vm10, %v117_v27, 0.0  ;;  %v180_v42 = vsel %vm129_vm7, %v268_v38, 0.0 }
  0x1c   :  { %v126_v34 = vsel %vm101_vm11, %v118_v30, 0.0  ;;  %151 = vst [vmem:[#allocation1 + $0x10] ss:$2 sm:$0xff] %v74_v4  ;;  %v135_v39 = vsel %vm129_vm7, %v125_v31, 0.0  ;;  %v181_v51 = vadd.f32 %v180_v42, %v179_v41  ;;  %v172_v58 = vld [vmem:[#allocation4] sm:$0xf] }
  0x1d   :  { %133 = vadd.xlane.f32.xlu0 %v132_v29  ;;  %v136_v40 = vsel %vm129_vm7, %v126_v34, 0.0  ;;  %v173_v4 = vld [vmem:[#allocation4 + $0x4] sm:$0xf] }
  0x1e   :  { %v137_v47 = vadd.f32 %v136_v40, %v135_v39 }
  0x20   :  { %v148_v43 = vld.sshfl [vmem:[#allocation1] sm:$0xff pattern:$0x75316420]  ;;  %v149_v44 = vld.sshfl [vmem:[#allocation1 + $0x8] sm:$0xff pattern:$0x75316420] }
  0x21   :  { %v158_v45 = vsel %vm129_vm7, %v148_v43, 0.0  ;;  %v159_v46 = vsel %vm129_vm7, %v149_v44, 0.0 }
  0x22   :  { %v160_v48 = vadd.f32 %v159_v46, %v158_v45  ;;  %182 = vadd.xlane.f32.xlu2 %v181_v51 }
  0x23   :  { %v152_v49 = vld.sshfl [vmem:[#allocation1 + $0x10] sm:$0xff pattern:$0x75316420]  ;;  %v153_v50 = vld.sshfl [vmem:[#allocation1 + $0x18] sm:$0xff pattern:$0x75316420] }
  0x24   :  { %161 = vadd.xlane.f32.xlu1 %v160_v48  ;;  %v163_v52 = vsel %vm129_vm7, %v152_v49, 0.0  ;;  %v164_v53 = vsel %vm129_vm7, %v153_v50, 0.0 }
  0x25   :  { %138 = vadd.xlane.f32.xlu0 %v137_v47  ;;  %v165_v54 = vadd.f32 %v164_v53, %v163_v52 }
  0x2c   :  { %166 = vadd.xlane.f32.xlu1 %v165_v54 }
  0x8d   :  { %v178_v60 = vpop.xlane.xlu2 %177 }
  0x8e   :  { %v184_v61 = vadd.f32 %v178_v60, %v172_v58 }
  0x90   :  { %v134_v57 = vpop.xlane.xlu0 %133  ;;  %186 = vst.msk [vmem:[#allocation4] sm:$0xf] %vm66_vm0, %v184_v61 }
  0x91   :  { %v140_v59 = vadd.f32 %v134_v57, %v127_v56 }
  0x93   :  { %143 = vst.msk [vmem:[#allocation2] sm:$0xf] %vm66_vm0, %v140_v59 }
  0x95   :  { %v183_v7 = vpop.xlane.xlu2 %182 }
  0x96   :  { %v185_v8 = vadd.f32 %v183_v7, %v173_v4 }
  0x97   :  { %v162_v0 = vpop.xlane.xlu1 %161  ;;  %v225_v14 = vld [vmem:[#allocation4] sm:$0xf] }
  0x98   :  { %v168_v2 = vadd.f32 %v162_v0, %v145_v62  ;;  %v139_v3 = vpop.xlane.xlu0 %138  ;;  %187 = vst.msk [vmem:[#allocation4 + $0x4] sm:$0xf] %vm66_vm0, %v185_v8 }
  0x99   :  { %v141_v5 = vadd.f32 %v139_v3, %v128_v63 }
  0x9a   :  { %170 = vst.msk [vmem:[#allocation3] sm:$0xf] %vm66_vm0, %v168_v2  ;;  %v191_v6 = vld [vmem:[#allocation2] sm:$0xf] }
  0x9b   :  { %144 = vst.msk [vmem:[#allocation2 + $0x4] sm:$0xf] %vm66_vm0, %v141_v5  ;;  %196 = vperm.xlu0 %278, %v191_v6  }
  0x9f   :  { %v167_v10 = vpop.xlane.xlu1 %166  ;;  %v226_v16 = vld [vmem:[#allocation4 + $0x4] sm:$0xf] }
  0xa0   :  { %v169_v11 = vadd.f32 %v167_v10, %v146_v9 }
  0xa1   :  { %v209_v12 = vld [vmem:[#allocation3] sm:$0xf] }
  0xa2   :  { %171 = vst.msk [vmem:[#allocation3 + $0x4] sm:$0xf] %vm66_vm0, %v169_v11  ;;  %214 = vperm.xlu2 %280, %v209_v12   ;;  %v192_v13 = vld [vmem:[#allocation2 + $0x4] sm:$0xf] }
  0xa3   :  { %199 = vperm.xlu1 %279, %v192_v13  }
  0xa9   :  { %v210_v15 = vld [vmem:[#allocation3 + $0x4] sm:$0xf] }
  0xaa   :  { %217 = vperm.xlu2 %280, %v210_v15  }
  0xab   :  { %230 = vperm.xlu1 %279, %v225_v14  }
  0xb2   :  { %233 = vperm.xlu2 %280, %v226_v16  }
  0xfc   :  { %v215_v17 = vpop.permute.xlu2 %214 }
  0xfd   :  { %v219_v19 = vperm.slane %v215_v17, %v202_v18 }
 0x104   :  { %v218_v20 = vpop.permute.xlu2 %217 }
 0x105   :  { %v220_v21 = vperm.slane %v218_v20, %v202_v18 }
 0x107   :  { %v221_v22 = vsel %vm87_vm4, %v220_v21, %v219_v19 }
 0x108   :  { %224 = vst.msk [vmem:[#allocation10 + $0x2] sm:$0x3] %vm207_vm12, %v221_v22 }
 0x10c   :  { %v234_v28 = vpop.permute.xlu2 %233 }
 0x10d   :  { %v197_v23 = vpop.permute.xlu0 %196  ;;  %v236_v29 = vperm.slane %v234_v28, %v202_v18 }
 0x10e   :  { %v203_v25 = vperm.slane %v197_v23, %v202_v18 }
 0x115   :  { %v200_v24 = vpop.permute.xlu1 %199 }
 0x116   :  { %v204_v26 = vperm.slane %v200_v24, %v202_v18 }
 0x118   :  { %v205_v27 = vsel %vm87_vm4, %v204_v26, %v203_v25 }
 0x119   :  { %208 = vst.msk [vmem:[#allocation10] sm:$0x3] %vm207_vm12, %v205_v27 }
 0x11d   :  { %v231_v1 = vpop.permute.xlu1 %230 }
 0x11e   :  { %v235_v30 = vperm.slane %v231_v1, %v202_v18 }
 0x120   :  { %v237_v31 = vsel %vm87_vm4, %v236_v29, %v235_v30 }
 0x121   :  { %240 = vst.msk [vmem:[#allocation10 + $0x4] sm:$0x3] %vm207_vm12, %v237_v31 }
 0x122   :  { %253 = dma.vmem_to_hbm [thread:$0]  %s246_s1, 96, %s248_s23, [#allocation7], %s366_s24, %s366_s24, %s367_s25  }
 0x123   :  { %357 = dma.done.wait [#allocation7], 96  }
 0x124   :  { %358 = vsyncadd [#allocation7], 4294967200 }
 0x125   :  { %258 = vsyncpa [#allocation6], 1 }
 0x126   :  { %259 = vsyncpa [#allocation9], 1 }
 0x127   :  { %260 = vsyncpa [#allocation7], 1 }

</bundles_post_ra>
